<compile_context>
chip_gen: v7x
topology: tpu7x:2x2x1
jax: 0.10.0
libtpu: 0.0.40
codegen_flags: <defaults>
</compile_context>

<pallas_src>
import functools

import jax
import jax.numpy as jnp
import numpy as np
from jax.experimental import pallas as pl
from jax.experimental.pallas import tpu as pltpu


def _patch_split_kernel(im_ref, out_ref, *, C, H, ph, pw, sh, sw, nW, R):
    """Emit R rows of patches per grid step.

    im_ref : (C*H, W) whole image, VMEM-resident (constant index_map => the
             auto-pipeline fetches it from HBM exactly once).
    out_ref: (R, nW, C*ph, pw) block of the (nH, nW, C*ph, pw) output, i.e.
             patch-major HBM layout -> no wrapper transpose needed.
    """
    i = pl.program_id(0)  # batched patch-row index

    for rr in range(R):                      # static unroll over batched rows
        row = i * R + rr                     # global patch-row index (traced)
        for c in range(C):                   # static unroll over channels
            # Rows [c*H + row*sh, c*H + row*sh + ph) of the folded image are
            # exactly the strip this (row, channel) needs.
            strip_c = im_ref[pl.ds(c * H + row * sh, ph), :]      # (ph, W)
            for j in range(nW):              # static unroll over patch cols
                out_ref[rr, j, c * ph:(c + 1) * ph, :] = (
                    strip_c[:, j * sw:j * sw + pw])


def patch_split(im: jax.Array, size=(8, 8), stride=(4, 4)) -> jax.Array:
    """Pallas equivalent of PatchSplitTransform.forward.

    Args:
      im: (C, H, W) image.
      size: patch size (ph, pw) or int.
      stride: patch stride (sh, sw) or int.

    Returns:
      (N, C, ph, pw) patches, N = nH * nW, n = i*nW + j.
    """
    ph, pw = (size, size) if isinstance(size, int) else size
    sh, sw = (stride, stride) if isinstance(stride, int) else stride

    C, H, W = im.shape
    nH = (H - ph) // sh + 1
    nW = (W - pw) // sw + 1
    N = nH * nW

    # Batch R patch-rows per grid step.  Pick the largest divisor of nH that
    # still leaves >= ~8 grid steps (megacore balance on v7x); exact division
    # keeps every block fully in bounds (no ragged-block handling needed).
    max_r = max(1, nH // 8)
    R = 1
    for d in range(max_r, 0, -1):
        if nH % d == 0:
            R = d
            break
    grid = (nH // R,)

    # Free fold: (C, H, W) -> (C*H, W); gives C*ph dense sublanes downstream.
    im2d = im.reshape(C * H, W)

    itemsize = jnp.dtype(im.dtype).itemsize
    im_bytes = C * H * W * itemsize
    out_block_bytes = R * nW * C * ph * pw * itemsize
    vmem_need = 2 * im_bytes + 2 * out_block_bytes + (2 << 20)
    vmem_limit = int(min(max(vmem_need, 32 << 20), 64 << 20))

    kernel = functools.partial(
        _patch_split_kernel, C=C, H=H, ph=ph, pw=pw, sh=sh, sw=sw, nW=nW, R=R
    )

    out = pl.pallas_call(
        kernel,
        out_shape=jax.ShapeDtypeStruct((nH, nW, C * ph, pw), im.dtype),
        grid_spec=pltpu.PrefetchScalarGridSpec(
            num_scalar_prefetch=0,
            grid=grid,
            in_specs=[
                # Whole image resident in VMEM; constant block index so the
                # auto-pipeline fetches it exactly once.
                pl.BlockSpec((C * H, W), lambda i: (0, 0)),
            ],
            out_specs=pl.BlockSpec(
                (R, nW, C * ph, pw), lambda i: (i, 0, 0, 0)
            ),
        ),
        compiler_params=pltpu.CompilerParams(
            dimension_semantics=("parallel",),
            vmem_limit_bytes=vmem_limit,
        ),
    )(im2d)

    # Free row-major reshape (no transpose, no extra HBM pass):
    # out[i, j, c*ph+ki, kj] -> patches[i*nW + j, c, ki, kj]
    return out.reshape(N, C, ph, pw)


def _reference_patch_split(im: np.ndarray, size, stride) -> np.ndarray:
    """Pure-numpy reference matching F.unfold + rearrange semantics."""
    C, H, W = im.shape
    ph, pw = size
    sh, sw = stride
    nH = (H - ph) // sh + 1
    nW = (W - pw) // sw + 1
    out = np.zeros((nH * nW, C, ph, pw), dtype=im.dtype)
    for i in range(nH):
        for j in range(nW):
            out[i * nW + j] = im[:, i * sh:i * sh + ph, j * sw:j * sw + pw]
    return out


if __name__ == "__main__":
    key = jax.random.PRNGKey(0)

    configs = [
        dict(C=4, H=16, W=16, size=(8, 8), stride=(4, 4)),  # nH=nW=3
        dict(C=3, H=28, W=20, size=(8, 8), stride=(4, 4)),  # odd-ish sizes, nH=6 nW=4
        dict(C=2, H=68, W=24, size=(8, 8), stride=(4, 4)),  # nH=16 -> R=2 row batching
        dict(C=2, H=72, W=24, size=(8, 8), stride=(4, 4)),  # nH=17 (prime) -> R=1
    ]

    for cfg in configs:
        key, sub = jax.random.split(key)
        im = jax.random.normal(
            sub, (cfg["C"], cfg["H"], cfg["W"]), dtype=jnp.float32
        )
        patches = patch_split(im, size=cfg["size"], stride=cfg["stride"])
        patches = jax.block_until_ready(patches)

        ref = _reference_patch_split(np.asarray(im), cfg["size"], cfg["stride"])
        np.testing.assert_allclose(np.asarray(patches), ref, rtol=0, atol=0)

    print("KERNEL_OK")
</pallas_src>

<mosaic_0001>
module attributes {stable_mosaic.version = 11 : i64} {
  func.func @_patch_split_kernel(%arg0: i32, %arg1: memref<64x16xf32, #tpu.memory_space<vmem>>, %arg2: memref<1x3x32x8xf32, #tpu.memory_space<vmem>>) attributes {dimension_semantics = [#tpu.dimension_semantics<parallel>], iteration_bounds = array<i64: 3>, scalar_prefetch = 0 : i64, scratch_operands = 0 : i64, tpu.core_type = #tpu.core_type<tc>, window_params = [{pipeline_mode = #tpu.pipeline_mode<synchronous>, transform_indices = @transform_0, window_bounds = array<i64: 64, 16>}, {transform_indices = @transform_1, window_bounds = array<i64: 1, 3, 32, 8>}]} {
    %c1_i32 = arith.constant 1 : i32
    %0 = arith.muli %arg0, %c1_i32 : i32
    %c0_i32 = arith.constant 0 : i32
    %1 = arith.addi %0, %c0_i32 : i32
    %c4_i32 = arith.constant 4 : i32
    %2 = arith.muli %1, %c4_i32 : i32
    %c0_i32_0 = arith.constant 0 : i32
    %3 = arith.addi %c0_i32_0, %2 : i32
    %4 = arith.index_cast %3 : i32 to index
    %c0 = arith.constant 0 : index
    %5 = vector.load %arg1[%4, %c0] : memref<64x16xf32, #tpu.memory_space<vmem>>, vector<8x16xf32>
    %6 = vector.extract_strided_slice %5 {offsets = [0, 0], sizes = [8, 8], strides = [1, 1]} : vector<8x16xf32> to vector<8x8xf32>
    %c0_1 = arith.constant 0 : index
    %c0_2 = arith.constant 0 : index
    %c0_3 = arith.constant 0 : index
    %c0_4 = arith.constant 0 : index
    %7 = vector.load %arg2[%c0_1, %c0_2, %c0_3, %c0_4] : memref<1x3x32x8xf32, #tpu.memory_space<vmem>>, vector<1x1x8x8xf32>
    %8 = vector.shape_cast %7 : vector<1x1x8x8xf32> to vector<8x8xf32>
    %9 = vector.shape_cast %6 : vector<8x8xf32> to vector<1x1x8x8xf32>
    tpu.vector_store %arg2[%c0_1, %c0_2, %c0_3, %c0_4], %9 {strides = array<i32>} : memref<1x3x32x8xf32, #tpu.memory_space<vmem>>, vector<1x1x8x8xf32>,
    %10 = vector.extract_strided_slice %5 {offsets = [0, 4], sizes = [8, 8], strides = [1, 1]} : vector<8x16xf32> to vector<8x8xf32>
    %c0_5 = arith.constant 0 : index
    %c1 = arith.constant 1 : index
    %c0_6 = arith.constant 0 : index
    %c0_7 = arith.constant 0 : index
    %11 = vector.load %arg2[%c0_5, %c1, %c0_6, %c0_7] : memref<1x3x32x8xf32, #tpu.memory_space<vmem>>, vector<1x1x8x8xf32>
    %12 = vector.shape_cast %11 : vector<1x1x8x8xf32> to vector<8x8xf32>
    %13 = vector.shape_cast %10 : vector<8x8xf32> to vector<1x1x8x8xf32>
    tpu.vector_store %arg2[%c0_5, %c1, %c0_6, %c0_7], %13 {strides = array<i32>} : memref<1x3x32x8xf32, #tpu.memory_space<vmem>>, vector<1x1x8x8xf32>,
    %14 = vector.extract_strided_slice %5 {offsets = [0, 8], sizes = [8, 8], strides = [1, 1]} : vector<8x16xf32> to vector<8x8xf32>
    %c0_8 = arith.constant 0 : index
    %c2 = arith.constant 2 : index
    %c0_9 = arith.constant 0 : index
    %c0_10 = arith.constant 0 : index
    %15 = vector.load %arg2[%c0_8, %c2, %c0_9, %c0_10] : memref<1x3x32x8xf32, #tpu.memory_space<vmem>>, vector<1x1x8x8xf32>
    %16 = vector.shape_cast %15 : vector<1x1x8x8xf32> to vector<8x8xf32>
    %17 = vector.shape_cast %14 : vector<8x8xf32> to vector<1x1x8x8xf32>
    tpu.vector_store %arg2[%c0_8, %c2, %c0_9, %c0_10], %17 {strides = array<i32>} : memref<1x3x32x8xf32, #tpu.memory_space<vmem>>, vector<1x1x8x8xf32>,
    %c4_i32_11 = arith.constant 4 : i32
    %18 = arith.muli %1, %c4_i32_11 : i32
    %c16_i32 = arith.constant 16 : i32
    %19 = arith.addi %c16_i32, %18 : i32
    %20 = arith.index_cast %19 : i32 to index
    %c0_12 = arith.constant 0 : index
    %21 = vector.load %arg1[%20, %c0_12] : memref<64x16xf32, #tpu.memory_space<vmem>>, vector<8x16xf32>
    %22 = vector.extract_strided_slice %21 {offsets = [0, 0], sizes = [8, 8], strides = [1, 1]} : vector<8x16xf32> to vector<8x8xf32>
    %c0_13 = arith.constant 0 : index
    %c0_14 = arith.constant 0 : index
    %c8 = arith.constant 8 : index
    %c0_15 = arith.constant 0 : index
    %23 = vector.load %arg2[%c0_13, %c0_14, %c8, %c0_15] : memref<1x3x32x8xf32, #tpu.memory_space<vmem>>, vector<1x1x8x8xf32>
    %24 = vector.shape_cast %23 : vector<1x1x8x8xf32> to vector<8x8xf32>
    %25 = vector.shape_cast %22 : vector<8x8xf32> to vector<1x1x8x8xf32>
    tpu.vector_store %arg2[%c0_13, %c0_14, %c8, %c0_15], %25 {strides = array<i32>} : memref<1x3x32x8xf32, #tpu.memory_space<vmem>>, vector<1x1x8x8xf32>,
    %26 = vector.extract_strided_slice %21 {offsets = [0, 4], sizes = [8, 8], strides = [1, 1]} : vector<8x16xf32> to vector<8x8xf32>
    %c0_16 = arith.constant 0 : index
    %c1_17 = arith.constant 1 : index
    %c8_18 = arith.constant 8 : index
    %c0_19 = arith.constant 0 : index
    %27 = vector.load %arg2[%c0_16, %c1_17, %c8_18, %c0_19] : memref<1x3x32x8xf32, #tpu.memory_space<vmem>>, vector<1x1x8x8xf32>
    %28 = vector.shape_cast %27 : vector<1x1x8x8xf32> to vector<8x8xf32>
    %29 = vector.shape_cast %26 : vector<8x8xf32> to vector<1x1x8x8xf32>
    tpu.vector_store %arg2[%c0_16, %c1_17, %c8_18, %c0_19], %29 {strides = array<i32>} : memref<1x3x32x8xf32, #tpu.memory_space<vmem>>, vector<1x1x8x8xf32>,
    %30 = vector.extract_strided_slice %21 {offsets = [0, 8], sizes = [8, 8], strides = [1, 1]} : vector<8x16xf32> to vector<8x8xf32>
    %c0_20 = arith.constant 0 : index
    %c2_21 = arith.constant 2 : index
    %c8_22 = arith.constant 8 : index
    %c0_23 = arith.constant 0 : index
    %31 = vector.load %arg2[%c0_20, %c2_21, %c8_22, %c0_23] : memref<1x3x32x8xf32, #tpu.memory_space<vmem>>, vector<1x1x8x8xf32>
    %32 = vector.shape_cast %31 : vector<1x1x8x8xf32> to vector<8x8xf32>
    %33 = vector.shape_cast %30 : vector<8x8xf32> to vector<1x1x8x8xf32>
    tpu.vector_store %arg2[%c0_20, %c2_21, %c8_22, %c0_23], %33 {strides = array<i32>} : memref<1x3x32x8xf32, #tpu.memory_space<vmem>>, vector<1x1x8x8xf32>,
    %c4_i32_24 = arith.constant 4 : i32
    %34 = arith.muli %1, %c4_i32_24 : i32
    %c32_i32 = arith.constant 32 : i32
    %35 = arith.addi %c32_i32, %34 : i32
    %36 = arith.index_cast %35 : i32 to index
    %c0_25 = arith.constant 0 : index
    %37 = vector.load %arg1[%36, %c0_25] : memref<64x16xf32, #tpu.memory_space<vmem>>, vector<8x16xf32>
    %38 = vector.extract_strided_slice %37 {offsets = [0, 0], sizes = [8, 8], strides = [1, 1]} : vector<8x16xf32> to vector<8x8xf32>
    %c0_26 = arith.constant 0 : index
    %c0_27 = arith.constant 0 : index
    %c16 = arith.constant 16 : index
    %c0_28 = arith.constant 0 : index
    %39 = vector.load %arg2[%c0_26, %c0_27, %c16, %c0_28] : memref<1x3x32x8xf32, #tpu.memory_space<vmem>>, vector<1x1x8x8xf32>
    %40 = vector.shape_cast %39 : vector<1x1x8x8xf32> to vector<8x8xf32>
    %41 = vector.shape_cast %38 : vector<8x8xf32> to vector<1x1x8x8xf32>
    tpu.vector_store %arg2[%c0_26, %c0_27, %c16, %c0_28], %41 {strides = array<i32>} : memref<1x3x32x8xf32, #tpu.memory_space<vmem>>, vector<1x1x8x8xf32>,
    %42 = vector.extract_strided_slice %37 {offsets = [0, 4], sizes = [8, 8], strides = [1, 1]} : vector<8x16xf32> to vector<8x8xf32>
    %c0_29 = arith.constant 0 : index
    %c1_30 = arith.constant 1 : index
    %c16_31 = arith.constant 16 : index
    %c0_32 = arith.constant 0 : index
    %43 = vector.load %arg2[%c0_29, %c1_30, %c16_31, %c0_32] : memref<1x3x32x8xf32, #tpu.memory_space<vmem>>, vector<1x1x8x8xf32>
    %44 = vector.shape_cast %43 : vector<1x1x8x8xf32> to vector<8x8xf32>
    %45 = vector.shape_cast %42 : vector<8x8xf32> to vector<1x1x8x8xf32>
    tpu.vector_store %arg2[%c0_29, %c1_30, %c16_31, %c0_32], %45 {strides = array<i32>} : memref<1x3x32x8xf32, #tpu.memory_space<vmem>>, vector<1x1x8x8xf32>,
    %46 = vector.extract_strided_slice %37 {offsets = [0, 8], sizes = [8, 8], strides = [1, 1]} : vector<8x16xf32> to vector<8x8xf32>
    %c0_33 = arith.constant 0 : index
    %c2_34 = arith.constant 2 : index
    %c16_35 = arith.constant 16 : index
    %c0_36 = arith.constant 0 : index
    %47 = vector.load %arg2[%c0_33, %c2_34, %c16_35, %c0_36] : memref<1x3x32x8xf32, #tpu.memory_space<vmem>>, vector<1x1x8x8xf32>
    %48 = vector.shape_cast %47 : vector<1x1x8x8xf32> to vector<8x8xf32>
    %49 = vector.shape_cast %46 : vector<8x8xf32> to vector<1x1x8x8xf32>
    tpu.vector_store %arg2[%c0_33, %c2_34, %c16_35, %c0_36], %49 {strides = array<i32>} : memref<1x3x32x8xf32, #tpu.memory_space<vmem>>, vector<1x1x8x8xf32>,
    %c4_i32_37 = arith.constant 4 : i32
    %50 = arith.muli %1, %c4_i32_37 : i32
    %c48_i32 = arith.constant 48 : i32
    %51 = arith.addi %c48_i32, %50 : i32
    %52 = arith.index_cast %51 : i32 to index
    %c0_38 = arith.constant 0 : index
    %53 = vector.load %arg1[%52, %c0_38] : memref<64x16xf32, #tpu.memory_space<vmem>>, vector<8x16xf32>
    %54 = vector.extract_strided_slice %53 {offsets = [0, 0], sizes = [8, 8], strides = [1, 1]} : vector<8x16xf32> to vector<8x8xf32>
    %c0_39 = arith.constant 0 : index
    %c0_40 = arith.constant 0 : index
    %c24 = arith.constant 24 : index
    %c0_41 = arith.constant 0 : index
    %55 = vector.load %arg2[%c0_39, %c0_40, %c24, %c0_41] : memref<1x3x32x8xf32, #tpu.memory_space<vmem>>, vector<1x1x8x8xf32>
    %56 = vector.shape_cast %55 : vector<1x1x8x8xf32> to vector<8x8xf32>
    %57 = vector.shape_cast %54 : vector<8x8xf32> to vector<1x1x8x8xf32>
    tpu.vector_store %arg2[%c0_39, %c0_40, %c24, %c0_41], %57 {strides = array<i32>} : memref<1x3x32x8xf32, #tpu.memory_space<vmem>>, vector<1x1x8x8xf32>,
    %58 = vector.extract_strided_slice %53 {offsets = [0, 4], sizes = [8, 8], strides = [1, 1]} : vector<8x16xf32> to vector<8x8xf32>
    %c0_42 = arith.constant 0 : index
    %c1_43 = arith.constant 1 : index
    %c24_44 = arith.constant 24 : index
    %c0_45 = arith.constant 0 : index
    %59 = vector.load %arg2[%c0_42, %c1_43, %c24_44, %c0_45] : memref<1x3x32x8xf32, #tpu.memory_space<vmem>>, vector<1x1x8x8xf32>
    %60 = vector.shape_cast %59 : vector<1x1x8x8xf32> to vector<8x8xf32>
    %61 = vector.shape_cast %58 : vector<8x8xf32> to vector<1x1x8x8xf32>
    tpu.vector_store %arg2[%c0_42, %c1_43, %c24_44, %c0_45], %61 {strides = array<i32>} : memref<1x3x32x8xf32, #tpu.memory_space<vmem>>, vector<1x1x8x8xf32>,
    %62 = vector.extract_strided_slice %53 {offsets = [0, 8], sizes = [8, 8], strides = [1, 1]} : vector<8x16xf32> to vector<8x8xf32>
    %c0_46 = arith.constant 0 : index
    %c2_47 = arith.constant 2 : index
    %c24_48 = arith.constant 24 : index
    %c0_49 = arith.constant 0 : index
    %63 = vector.load %arg2[%c0_46, %c2_47, %c24_48, %c0_49] : memref<1x3x32x8xf32, #tpu.memory_space<vmem>>, vector<1x1x8x8xf32>
    %64 = vector.shape_cast %63 : vector<1x1x8x8xf32> to vector<8x8xf32>
    %65 = vector.shape_cast %62 : vector<8x8xf32> to vector<1x1x8x8xf32>
    tpu.vector_store %arg2[%c0_46, %c2_47, %c24_48, %c0_49], %65 {strides = array<i32>} : memref<1x3x32x8xf32, #tpu.memory_space<vmem>>, vector<1x1x8x8xf32>,
    return
  }
  func.func @transform_0(%arg0: i32) -> (i32, i32) {
    %c0_i32 = arith.constant 0 : i32
    %c0_i32_0 = arith.constant 0 : i32
    %c0_i32_1 = arith.constant 0 : i32
    return %c0_i32, %c0_i32_0 : i32, i32
  }
  func.func @transform_1(%arg0: i32) -> (i32, i32, i32, i32) {
    %c0_i32 = arith.constant 0 : i32
    %c0_i32_0 = arith.constant 0 : i32
    %c0_i32_1 = arith.constant 0 : i32
    %c0_i32_2 = arith.constant 0 : i32
    return %arg0, %c0_i32, %c0_i32_0, %c0_i32_1 : i32, i32, i32, i32
  }
}

</mosaic_0001>

<bundles_post_ra>
// kernel: tpu_custom_call.1
= control target key start
LH: loop header
LB: loop body
LE: loop exit
PB: predicated region body
PF: predicated region fallthrough
CT: control target
= control target key end

     0   :  { %s259_s6 = smov 0   ;;  %s288_s0 = inlined_call_operand.vmem [shape: f32[64,16], index: 0, kind: input, shape index: {}]   ;;  %s289_s1 = inlined_call_operand.vmem [shape: f32[3,3,32,8], index: 1, kind: output, shape index: {}]  }
   0x1 LB: > { %s206_s7 = sadd.s32 4294967295, %s245_s6   ;;  %p209_p0 = scmp.ge.s32.totalorder %s245_s6, 1  ;;  %s245_s6 = sphi %s259_s6, %s11_s6  }
   0x2   : > { %p77_p1 = scmp.lt.s32.totalorder %s245_s6, 4 }
   0x4   : > { %p78_p2 = pnand %p209_p0, %p77_p1 }
   0x5   : > { %s211_s8 = sshll.u32 (!%p78_p2), %s206_s7, 2  ;;  %p92_p3 = scmp.lt.s32.totalorder (!%p78_p2), %s206_s7, 2  ;;  %vm100_vm0 = vcmask (!%p78_p2), 64512  }
   0x6   : > { %81 = sbr.rel (%p78_p2) target bundleno = 136 (0x88), region = 24  ;;  %s98_s11 = scalar_lea.vmem (!%p78_p2), %s288_s0, %s211_s8 }
   0x7   : > { %v215_v0 = vld [vmem:[%s98_s11 + $0x10] sm:$0xff] (!%p78_p2)  ;;  %v99_v1 = vld [vmem:[%s98_s11] sm:$0xff] (!%p78_p2)  ;;  %s247_s12 = smov (!%p78_p2), 124   ;;  %s248_s17 = smov (!%p78_p2), 120  }
   0x8   : > { %118 = vrot.lane.b32.xlu1 (!%p78_p2), %v215_v0, %s247_s12  ;;  %103 = vrot.lane.b32.xlu0 (!%p78_p2), %v99_v1, %s247_s12  ;;  %v219_v2 = vld [vmem:[%s98_s11 + $0x20] sm:$0xff] (!%p78_p2)  ;;  %v223_v3 = vld [vmem:[%s98_s11 + $0x30] sm:$0xff] (!%p78_p2) }
   0xc   : > { %122 = vrot.lane.b32.xlu1 (!%p78_p2), %v215_v0, %s248_s17  ;;  %108 = vrot.lane.b32.xlu0 (!%p78_p2), %v99_v1, %s248_s17 }
   0xd   : > { %s291_s7 = smov (!%p92_p3, %s206_s7), 2 }
   0xe   : > { %s228_s13 = smul.u32 96, %s291_s7 }
  0x10   : > { %s96_s16 = scalar_lea.vmem %s289_s1, %s228_s13  ;;  %135 = vrot.lane.b32.xlu1 %v219_v2, %s248_s17  ;;  %131 = vrot.lane.b32.xlu0 %v219_v2, %s247_s12 }
  0x11   : > { %116 = vst.msk [vmem:[%s96_s16 + $0x8] sm:$0xff] %vm100_vm0, %v215_v0  ;;  %101 = vst.msk [vmem:[%s96_s16] sm:$0xff] %vm100_vm0, %v99_v1 }
  0x12   : > { %129 = vst.msk [vmem:[%s96_s16 + $0x10] sm:$0xff] %vm100_vm0, %v219_v2  ;;  %142 = vst.msk [vmem:[%s96_s16 + $0x18] sm:$0xff] %vm100_vm0, %v223_v3 }
  0x14   : > { %148 = vrot.lane.b32.xlu1 %v223_v3, %s248_s17  ;;  %144 = vrot.lane.b32.xlu0 %v223_v3, %s247_s12 }
  0x7a   : > { %v119_v4 = vpop.permute.xlu1 %118  ;;  %v104_v5 = vpop.permute.xlu0 %103 }
  0x7b   : > { %216 = vst.msk [vmem:[%s96_s16 + $0x28] sm:$0xff] %vm100_vm0, %v119_v4  ;;  %212 = vst.msk [vmem:[%s96_s16 + $0x20] sm:$0xff] %vm100_vm0, %v104_v5 }
  0x7e   : > { %v123_v6 = vpop.permute.xlu1 %122  ;;  %v109_v7 = vpop.permute.xlu0 %108 }
  0x7f   : > { %217 = vst.msk [vmem:[%s96_s16 + $0x48] sm:$0xff] %vm100_vm0, %v123_v6  ;;  %213 = vst.msk [vmem:[%s96_s16 + $0x40] sm:$0xff] %vm100_vm0, %v109_v7 }
  0x82   : > { %v136_v8 = vpop.permute.xlu1 %135  ;;  %v132_v9 = vpop.permute.xlu0 %131 }
  0x83   : > { %221 = vst.msk [vmem:[%s96_s16 + $0x50] sm:$0xff] %vm100_vm0, %v136_v8  ;;  %220 = vst.msk [vmem:[%s96_s16 + $0x30] sm:$0xff] %vm100_vm0, %v132_v9 }
  0x86   : > { %v149_v10 = vpop.permute.xlu1 %148  ;;  %v145_v11 = vpop.permute.xlu0 %144 }
  0x87   : > { %225 = vst.msk [vmem:[%s96_s16 + $0x58] sm:$0xff] %vm100_vm0, %v149_v10  ;;  %224 = vst.msk [vmem:[%s96_s16 + $0x38] sm:$0xff] %vm100_vm0, %v145_v11 }
  0x88 PF: > { %s11_s6 = sadd.s32 1, %s245_s6  }
  0x89   : > { %p8_p4 = scmp.ge.s32.totalorder %s11_s6, 5  }
  0x8b   :  { %10 = sbr.rel (!%p8_p4) target bundleno = 1 (0x1), region = 57 }

</bundles_post_ra>
